<compile_context>
chip_gen: v6e
topology: v6e:2x2x1
jax: 0.10.0
libtpu: 0.0.40
codegen_flags: <defaults>
</compile_context>

<pallas_src>
import jax
import jax.numpy as jnp
from jax.experimental import pallas as pl
from jax.experimental.pallas import tpu as pltpu


def _conv1x1_vpu_kernel(x_ref, w_ref, b_ref, o_ref):
    # x_ref: (C_in, TM)   w_ref: (C_out, C_in)   b_ref: (C_out, 1)
    # o_ref: (C_out, TM)
    x = x_ref[...].astype(jnp.float32)
    w = w_ref[...].astype(jnp.float32)
    acc = jnp.broadcast_to(b_ref[...].astype(jnp.float32), o_ref.shape)
    c_in = x_ref.shape[0]
    for ci in range(c_in):                      # static, tiny (<= 16)
        acc = acc + w[:, ci:ci + 1] * x[ci:ci + 1, :]
    o_ref[...] = acc.astype(o_ref.dtype)


def _conv1x1_mxu_kernel(x_ref, w_ref, b_ref, o_ref):
    # Large channel counts: out = W (C_out, C_in) @ x (C_in, TM) on the MXU.
    acc = jnp.dot(w_ref[...], x_ref[...], preferred_element_type=jnp.float32)
    o_ref[...] = (acc + b_ref[...].astype(jnp.float32)).astype(o_ref.dtype)


def _pick_tile(hw, c_in, c_out, itemsize, budget_bytes=4 << 20, cap=16384):
    """Largest lane-dense spatial tile (multiple of 128) inside a VMEM budget."""
    per_col = (c_in + c_out) * itemsize
    tm = max(128, (budget_bytes // per_col) // 128 * 128)
    tm = min(tm, cap)
    if hw <= tm:
        return hw          # one block spans the whole spatial extent
    return tm


def conv_out_forward(x_nchw, weight, bias, *, tm=None):
    """1x1 conv, equivalent to nn.Conv2d(in_ch, out_ch, kernel_size=1).

    x_nchw : (N, C_in, H, W)
    weight : (C_out, C_in, 1, 1)   (PyTorch conv weight layout)
    bias   : (C_out,)
    returns: (N, C_out, H, W)
    """
    N, C_in, H, W = x_nchw.shape
    C_out = weight.shape[0]
    HW = H * W

    x3 = x_nchw.reshape(N, C_in, HW)            # free reshape, stays NCHW
    w = weight.reshape(C_out, C_in)
    b = bias.reshape(C_out, 1)                  # broadcasts over lanes in-kernel

    itemsize = jnp.dtype(x_nchw.dtype).itemsize
    if tm is None:
        tm = _pick_tile(HW, C_in, C_out, itemsize)
    num_m = pl.cdiv(HW, tm)
    grid = (N, num_m)

    # Tiny-channel case: VPU broadcast-FMA path; otherwise MXU dot.
    kernel = _conv1x1_vpu_kernel if max(C_in, C_out) <= 16 else _conv1x1_mxu_kernel

    # Double-buffered x + out blocks plus resident w/b; keep well under
    # v7x's 64 MiB physical VMEM.
    block_bytes = (C_in + C_out) * tm * itemsize
    vmem_limit = int(min(48 << 20, max(16 << 20, 6 * block_bytes)))

    out3 = pl.pallas_call(
        kernel,
        out_shape=jax.ShapeDtypeStruct((N, C_out, HW), x_nchw.dtype),
        grid_spec=pltpu.PrefetchScalarGridSpec(
            num_scalar_prefetch=0,
            grid=grid,
            in_specs=[
                # x: (N, C_in, HW) -> kernel sees (C_in, TM), lane-dense spatial
                pl.BlockSpec((None, C_in, tm), lambda n, m: (n, 0, m)),
                # weight: whole (C_out, C_in), constant (no re-DMA per step)
                pl.BlockSpec((C_out, C_in), lambda n, m: (0, 0)),
                # bias: (C_out, 1), constant
                pl.BlockSpec((C_out, 1), lambda n, m: (0, 0)),
            ],
            out_specs=pl.BlockSpec((None, C_out, tm), lambda n, m: (n, 0, m)),
        ),
        compiler_params=pltpu.CompilerParams(
            dimension_semantics=("parallel", "parallel"),
            vmem_limit_bytes=vmem_limit,
        ),
    )(x3, w, b)

    return out3.reshape(N, C_out, H, W)


if __name__ == "__main__":
    key = jax.random.PRNGKey(0)
    k_x, k_w, k_b = jax.random.split(key, 3)

    batch, in_ch, out_ch, spatial = 2, 4, 4, 16
    x = jax.random.normal(k_x, (batch, in_ch, spatial, spatial), jnp.float32)

    # Deterministic parameter init (matching nn.Conv2d shapes: (out_ch, in_ch, 1, 1))
    fan_in = in_ch  # kernel_size = 1
    bound = 1.0 / (fan_in ** 0.5)
    weight = jax.random.uniform(k_w, (out_ch, in_ch, 1, 1), jnp.float32,
                                minval=-bound, maxval=bound)
    bias = jax.random.uniform(k_b, (out_ch,), jnp.float32,
                              minval=-bound, maxval=bound)

    out = conv_out_forward(x, weight, bias)
    jax.block_until_ready(out)

    # Reference check against plain-JAX 1x1 conv (einsum over channels).
    ref = jnp.einsum("nchw,oc->nohw", x, weight.reshape(out_ch, in_ch)) \
        + bias.reshape(1, out_ch, 1, 1)
    assert out.shape == (batch, out_ch, spatial, spatial)
    assert jnp.allclose(out, ref, atol=1e-5, rtol=1e-5)

    print("KERNEL_OK")
</pallas_src>

<mosaic_0001>
module attributes {stable_mosaic.version = 11 : i64} {
  func.func @_conv1x1_vpu_kernel(%arg0: i32, %arg1: i32, %arg2: memref<1x4x256xf32, #tpu.memory_space<vmem>>, %arg3: memref<4x4xf32, #tpu.memory_space<vmem>>, %arg4: memref<4x1xf32, #tpu.memory_space<vmem>>, %arg5: memref<1x4x256xf32, #tpu.memory_space<vmem>>) attributes {dimension_semantics = [#tpu.dimension_semantics<parallel>, #tpu.dimension_semantics<parallel>], iteration_bounds = array<i64: 2, 1>, scalar_prefetch = 0 : i64, scratch_operands = 0 : i64, tpu.core_type = #tpu.core_type<tc>, window_params = [{transform_indices = @transform_0, window_bounds = array<i64: 1, 4, 256>}, {pipeline_mode = #tpu.pipeline_mode<synchronous>, transform_indices = @transform_1, window_bounds = array<i64: 4, 4>}, {pipeline_mode = #tpu.pipeline_mode<synchronous>, transform_indices = @transform_2, window_bounds = array<i64: 4, 1>}, {transform_indices = @transform_3, window_bounds = array<i64: 1, 4, 256>}]} {
    %c0 = arith.constant 0 : index
    %c0_0 = arith.constant 0 : index
    %c0_1 = arith.constant 0 : index
    %0 = vector.load %arg2[%c0, %c0_0, %c0_1] : memref<1x4x256xf32, #tpu.memory_space<vmem>>, vector<1x4x256xf32>
    %1 = vector.shape_cast %0 : vector<1x4x256xf32> to vector<4x256xf32>
    %c0_2 = arith.constant 0 : index
    %c0_3 = arith.constant 0 : index
    %2 = vector.load %arg3[%c0_2, %c0_3] : memref<4x4xf32, #tpu.memory_space<vmem>>, vector<4x4xf32>
    %c0_4 = arith.constant 0 : index
    %c0_5 = arith.constant 0 : index
    %3 = vector.load %arg4[%c0_4, %c0_5] : memref<4x1xf32, #tpu.memory_space<vmem>>, vector<4x1xf32>
    %4 = vector.shape_cast %3 : vector<4x1xf32> to vector<4x1xf32>
    %5 = vector.broadcast %4 : vector<4x1xf32> to vector<4x256xf32>
    %6 = vector.extract_strided_slice %2 {offsets = [0, 0], sizes = [4, 1], strides = [1, 1]} : vector<4x4xf32> to vector<4x1xf32>
    %7 = vector.extract_strided_slice %1 {offsets = [0, 0], sizes = [1, 256], strides = [1, 1]} : vector<4x256xf32> to vector<1x256xf32>
    %8 = vector.broadcast %6 : vector<4x1xf32> to vector<4x256xf32>
    %9 = vector.broadcast %7 : vector<1x256xf32> to vector<4x256xf32>
    %10 = arith.mulf %8, %9 : vector<4x256xf32>
    %11 = arith.addf %5, %10 : vector<4x256xf32>
    %12 = vector.extract_strided_slice %2 {offsets = [0, 1], sizes = [4, 1], strides = [1, 1]} : vector<4x4xf32> to vector<4x1xf32>
    %13 = vector.extract_strided_slice %1 {offsets = [1, 0], sizes = [1, 256], strides = [1, 1]} : vector<4x256xf32> to vector<1x256xf32>
    %14 = vector.broadcast %12 : vector<4x1xf32> to vector<4x256xf32>
    %15 = vector.broadcast %13 : vector<1x256xf32> to vector<4x256xf32>
    %16 = arith.mulf %14, %15 : vector<4x256xf32>
    %17 = arith.addf %11, %16 : vector<4x256xf32>
    %18 = vector.extract_strided_slice %2 {offsets = [0, 2], sizes = [4, 1], strides = [1, 1]} : vector<4x4xf32> to vector<4x1xf32>
    %19 = vector.extract_strided_slice %1 {offsets = [2, 0], sizes = [1, 256], strides = [1, 1]} : vector<4x256xf32> to vector<1x256xf32>
    %20 = vector.broadcast %18 : vector<4x1xf32> to vector<4x256xf32>
    %21 = vector.broadcast %19 : vector<1x256xf32> to vector<4x256xf32>
    %22 = arith.mulf %20, %21 : vector<4x256xf32>
    %23 = arith.addf %17, %22 : vector<4x256xf32>
    %24 = vector.extract_strided_slice %2 {offsets = [0, 3], sizes = [4, 1], strides = [1, 1]} : vector<4x4xf32> to vector<4x1xf32>
    %25 = vector.extract_strided_slice %1 {offsets = [3, 0], sizes = [1, 256], strides = [1, 1]} : vector<4x256xf32> to vector<1x256xf32>
    %26 = vector.broadcast %24 : vector<4x1xf32> to vector<4x256xf32>
    %27 = vector.broadcast %25 : vector<1x256xf32> to vector<4x256xf32>
    %28 = arith.mulf %26, %27 : vector<4x256xf32>
    %29 = arith.addf %23, %28 : vector<4x256xf32>
    %c0_6 = arith.constant 0 : index
    %c0_7 = arith.constant 0 : index
    %c0_8 = arith.constant 0 : index
    %30 = vector.load %arg5[%c0_6, %c0_7, %c0_8] : memref<1x4x256xf32, #tpu.memory_space<vmem>>, vector<1x4x256xf32>
    %31 = vector.shape_cast %30 : vector<1x4x256xf32> to vector<4x256xf32>
    %32 = vector.shape_cast %29 : vector<4x256xf32> to vector<1x4x256xf32>
    tpu.vector_store %arg5[%c0_6, %c0_7, %c0_8], %32 {strides = array<i32>} : memref<1x4x256xf32, #tpu.memory_space<vmem>>, vector<1x4x256xf32>,
    return
  }
  func.func @transform_0(%arg0: i32, %arg1: i32) -> (i32, i32, i32) {
    %c0_i32 = arith.constant 0 : i32
    %c0_i32_0 = arith.constant 0 : i32
    return %arg0, %c0_i32, %arg1 : i32, i32, i32
  }
  func.func @transform_1(%arg0: i32, %arg1: i32) -> (i32, i32) {
    %c0_i32 = arith.constant 0 : i32
    %c0_i32_0 = arith.constant 0 : i32
    %c0_i32_1 = arith.constant 0 : i32
    return %c0_i32, %c0_i32_0 : i32, i32
  }
  func.func @transform_2(%arg0: i32, %arg1: i32) -> (i32, i32) {
    %c0_i32 = arith.constant 0 : i32
    %c0_i32_0 = arith.constant 0 : i32
    %c0_i32_1 = arith.constant 0 : i32
    return %c0_i32, %c0_i32_0 : i32, i32
  }
  func.func @transform_3(%arg0: i32, %arg1: i32) -> (i32, i32, i32) {
    %c0_i32 = arith.constant 0 : i32
    %c0_i32_0 = arith.constant 0 : i32
    return %arg0, %c0_i32, %arg1 : i32, i32, i32
  }
}

</mosaic_0001>

<bundles_post_ra>
// kernel: tpu_custom_call.1
= control target key start
LH: loop header
LB: loop body
LE: loop exit
PB: predicated region body
PF: predicated region fallthrough
CT: control target
= control target key end

     0   :  { %8 = vsyncpa [#allocation3], 0  ;;  %s794_s0 = inlined_call_operand.hbm [shape: f32[2,4,256], index: 0, kind: input, shape index: {}]   ;;  %s795_s1 = inlined_call_operand.vmem [shape: f32[4,4], index: 1, kind: input, shape index: {}]   ;;  %s796_s2 = inlined_call_operand.vmem [shape: f32[4,1], index: 2, kind: input, shape index: {}]   ;;  %s797_s3 = inlined_call_operand.hbm [shape: f32[2,4,256], index: 3, kind: output, shape index: {}]  }
   0x1   :  { %10 = vsyncpa [#allocation3 + $0x1], 0 }
   0x2   :  { %11 = vsyncpa [#allocation4], 0 }
   0x3   :  { %13 = vsyncpa [#allocation4 + $0x1], 0  ;;  %s650_s12 = smov 0   ;;  %s652_s13 = smov 0  }
   0x4   :  { %s654_s14 = smov 0   ;;  %s656_s15 = smov 0  }
   0x5   :  { %s658_s16 = smov 0   ;;  %s660_s17 = smov 0  }
   0x6 LB: > { %s427_s18 = sadd.s32 4294967295, %s622_s17   ;;  %s428_s19 = sadd.s32 4294967294, %s622_s17   ;;  %s622_s17 = sphi %s660_s17, %s19_s17   ;;  %s618_s16 = sphi %s658_s16, %s809_s16   ;;  %s614_s15 = sphi %s656_s15, %s808_s15   ;;  %s610_s14 = sphi %s654_s14, %s807_s14   ;;  %s606_s13 = sphi %s652_s13, %s806_s13   ;;  %s602_s12 = sphi %s650_s12, %s805_s12  }
   0x7   : > { %s31_s20 = sadd.s32 1, %s618_s16  ;;  %s40_s21 = sadd.s32 1, %s610_s14 }
   0x8   : > { %p33_p0 = scmp.ge.s32.totalorder %s31_s20, 2  ;;  %p47_p1 = scmp.ne.s32.totalorder %s610_s14, %s606_s13 }
   0x9   : > { %p48_p2 = scmp.eq.s32.totalorder %s622_s17, 0  ;;  %p53_p3 = scmp.ne.s32.totalorder %s606_s13, %s602_s12 }
   0xa   : > { %s811_s20 = smov (%p33_p0, %s31_s20), 0  ;;  %p54_p5 = scmp.eq.s32.totalorder %s427_s18, 0 }
   0xb   : > { %p691_p4 = por %p48_p2, %p47_p1  ;;  %s35_s23 = ssub.s32 %s618_s16, %s811_s20 }
   0xc   : > { %p121_p6 = scmp.eq.s32.totalorder %s427_s18, 1  ;;  %p38_p7 = scmp.eq.s32.totalorder %s35_s23, 0 }
   0xd   : > { %p697_p8 = por %p54_p5, %p53_p3  ;;  %p127_p10 = scmp.eq.s32.totalorder %s428_s19, 1 }
   0xe   : > { %p701_p9 = por %p121_p6, %p47_p1  ;;  %p456_p13 = scmp.lt.s32.totalorder %s622_s17, 2 }
   0xf   : > { %s706_s26 = scalar_select %p38_p7, %s610_s14, %s40_s21  }
  0x10   : > { %p708_p11 = por %p127_p10, %p53_p3  ;;  %s153_s28 = sand.u32 1, %s610_s14  }
  0x11   : > { %s431_s29 = sshll.u32 %s153_s28, 3  ;;  %s442_s30 = sshll.u32 %s618_s16, 7 }
  0x12   : > { %s801_s27 = scalar_select %p708_p11, 1, 0 }
  0x13   : > { %s165_s6 = scalar_lea.hbm %s794_s0, %s442_s30  ;;  %s157_s7 = scalar_lea.vmem [#allocation2], %s431_s29 }
  0x14   : > { %s167_s8 = sshll.u32 %s157_s7, 4  ;;  %p721_p0 = pnand %p456_p13, %p691_p4  ;;  %s168_s8 = int_to_ptr.vmem [resolvable:$true] %s167_s8 }
  0x15   : > { %p434_p1 = scmp.ge.s32.totalorder %s622_s17, 1  ;;  %p172_p2 = scmp.lt.s32.totalorder %s622_s17, 3 }
  0x16   : > { %s154_s10 = scalar_lea.sflag [#allocation3], %s153_s28  ;;  %p516_p3 = pneg %p721_p0 }
  0x17   : > { %s527_s11 = scalar_lea.vmem %s168_s8, 128  ;;  %s624_s18 = smov [#allocation2]  }
  0x18   : > { %p528_p5 = scmp.ne.s32.totalorder %s168_s8, %s527_s11  ;;  %s532_s19 = sshll.u32 %s624_s18, 4  ;;  %s533_s19 = int_to_ptr.vmem [resolvable:$false] %s532_s19 }
  0x19   : > { %s534_s21 = scalar_lea.vmem %s533_s19, 256  ;;  %p535_p10 = scmp.lt.s32.totalorder %s168_s8, %s533_s19 }
  0x1a   : > { %p530_p6 = pnand %p528_p5, %p516_p3  ;;  %p536_p12 = scmp.lt.s32.totalorder %s534_s21, %s527_s11 }
  0x1c   : > { %p531_p7 = pneg %p530_p6  ;;  %p537_p4 = por %p536_p12, %p535_p10 }
  0x1e   : > { %p538_p13 = pnand %p537_p4, %p531_p7 }
  0x20   : > { %541 = shalt.err (!%p538_p13)
}
  0x21   : > { %451 = dma.hbm_to_vmem [thread:$0]  (!%p721_p0), %s165_s6, 128, %s168_s8, %s154_s10  }
  0x22   : > { %p173_p11 = pnand %p434_p1, %p172_p2 }
  0x23   : > { %s736_s22 = sand.u32 (!%p173_p11), 1, %s606_s13  }
  0x24   : > { %176 = sbr.rel (%p173_p11) target bundleno = 196 (0xc4), region = 32  ;;  %s435_s23 = sshll.u32 (!%p173_p11), %s736_s22, 3 }
  0x25   : > { %s179_s28 = scalar_lea.sflag (!%p173_p11), [#allocation3], %s736_s22  ;;  %s182_s29 = scalar_lea.vmem (!%p173_p11), [#allocation2], %s435_s23 }
  0x29   : > { %593 = dma.done.wait (%p697_p8), %s179_s28, 128  }
  0x2a   : > { %595 = vsyncadd (%p697_p8), %s179_s28, 4294967168  ;;  %v625_v0 = vmov 0   ;;  %v626_v1 = vmov 1   ;;  %v208_v2 = vld [vmem:[%s795_s1] sm:$0xf]  ;;  %v627_v4 = vmov 2   ;;  %v221_v6 = vlaneseq }
  0x2b   : > { %510 = vset.pattern.permute.xlu0 %v625_v0  ;;  %511 = vset.pattern.permute.xlu1 %v626_v1  ;;  %v209_v3 = vld [vmem:[%s796_s2] sm:$0xf]  ;;  %v628_v5 = vmov 3   ;;  %s443_s24 = sshll.u32 %s614_s15, 7  ;;  %s204_s7 = scalar_lea.vmem [#allocation5], %s435_s23 }
  0x2c   : > { %217 = vperm.xlu0 %510, %v208_v2   ;;  %244 = vperm.xlu1 %511, %v208_v2   ;;  %v222_v7 = vshrl.u32 %v221_v6, 7  ;;  %v207_v10 = vld [vmem:[%s182_s29] sm:$0xff]  ;;  %s343_s8 = sshll.u32 %s204_s7, 4  ;;  %s341_s11 = scalar_lea.hbm %s797_s3, %s443_s24  ;;  %s344_s8 = int_to_ptr.vmem [resolvable:$true] %s343_s8 }
  0x2d   : > { %s327_s18 = scalar_lea.sflag [#allocation4], %s736_s22  ;;  %s542_s19 = scalar_lea.vmem %s344_s8, 128 }
  0x2e   : > { %v223_v8 = vsub.s32 0, %v222_v7  ;;  %v227_v9 = vsub.s32 4, %v222_v7  ;;  %v249_v11 = vsub.s32 1, %v222_v7  ;;  %v253_v12 = vsub.s32 5, %v222_v7  ;;  %p543_p8 = scmp.ne.s32.totalorder %s344_s8, %s542_s19  ;;  %s629_s21 = smov [#allocation5]  }
  0x2f   : > { %v275_v13 = vsub.s32 2, %v222_v7  ;;  %v279_v14 = vsub.s32 6, %v222_v7  ;;  %v301_v21 = vsub.s32 3, %v222_v7  ;;  %v305_v22 = vsub.s32 7, %v222_v7  ;;  %s546_s15 = sshll.u32 %s629_s21, 4  ;;  %s547_s15 = int_to_ptr.vmem [resolvable:$false] %s546_s15 }
  0x30   : > { %212 = vperm.xlu0 %510, %v209_v3   ;;  %512 = vset.pattern.permute.xlu1 %v627_v4  ;;  %v224_v15 = vrot.slane %v207_v10, %v223_v8  ;;  %v228_v16 = vrot.slane %v207_v10, %v227_v9  ;;  %v250_v17 = vrot.slane %v207_v10, %v249_v11  ;;  %p544_p11 = pnand %p543_p8, %p701_p9  ;;  %s548_s23 = scalar_lea.vmem %s547_s15, 256 }
  0x31   : > { %270 = vperm.xlu1 %512, %v208_v2   ;;  %v254_v18 = vrot.slane %v207_v10, %v253_v12  ;;  %v276_v19 = vrot.slane %v207_v10, %v275_v13  ;;  %v280_v20 = vrot.slane %v207_v10, %v279_v14  ;;  %v302_v31 = vrot.slane %v207_v10, %v301_v21  ;;  %p549_p0 = scmp.lt.s32.totalorder %s344_s8, %s547_s15  ;;  %p550_p1 = scmp.lt.s32.totalorder %s548_s23, %s542_s19 }
  0x32   : > { %v234_v23 = vrot.slane %v224_v15, %v223_v8  ;;  %v238_v24 = vrot.slane %v228_v16, %v223_v8  ;;  %v260_v27 = vrot.slane %v250_v17, %v249_v11  ;;  %v306_v32 = vrot.slane %v207_v10, %v305_v22  ;;  %p545_p12 = pneg %p544_p11 }
  0x33   : > { %v264_v28 = vrot.slane %v254_v18, %v249_v11  ;;  %v286_v29 = vrot.slane %v276_v19, %v275_v13  ;;  %v290_v30 = vrot.slane %v280_v20, %v275_v13  ;;  %v312_v43 = vrot.slane %v302_v31, %v301_v21  ;;  %p551_p2 = por %p550_p1, %p549_p0 }
  0x34   : > { %513 = vset.pattern.permute.xlu0 %v628_v5  ;;  %v316_v44 = vrot.slane %v306_v32, %v301_v21 }
  0x35   : > { %296 = vperm.xlu0 %513, %v208_v2   ;;  %p552_p3 = pnand %p551_p2, %p545_p12 }
  0xa7   : > { %v218_v25 = vpop.permute.xlu0 %217  ;;  %v245_v26 = vpop.permute.xlu1 %244 }
  0xa8   : > { %v239_v33 = vmul.f32 %v234_v23, %v218_v25  ;;  %v240_v34 = vmul.f32 %v238_v24, %v218_v25  ;;  %v265_v36 = vmul.f32 %v260_v27, %v245_v26  ;;  %v266_v37 = vmul.f32 %v264_v28, %v245_v26 }
  0xab   : > { %v213_v35 = vpop.permute.xlu0 %212 }
  0xac   : > { %v241_v38 = vadd.f32 %v239_v33, %v213_v35  ;;  %v242_v39 = vadd.f32 %v240_v34, %v213_v35  ;;  %v271_v40 = vpop.permute.xlu1 %270 }
  0xad   : > { %v291_v41 = vmul.f32 %v286_v29, %v271_v40  ;;  %v292_v42 = vmul.f32 %v290_v30, %v271_v40 }
  0xae   : > { %v267_v45 = vadd.f32 %v265_v36, %v241_v38  ;;  %v268_v46 = vadd.f32 %v266_v37, %v242_v39 }
  0xb0   : > { %v293_v47 = vadd.f32 %v291_v41, %v267_v45  ;;  %v294_v48 = vadd.f32 %v292_v42, %v268_v46  ;;  %v297_v49 = vpop.permute.xlu0 %296 }
  0xb1   : > { %v317_v50 = vmul.f32 %v312_v43, %v297_v49  ;;  %v318_v51 = vmul.f32 %v316_v44, %v297_v49 }
  0xb3   : > { %v319_v52 = vadd.f32 %v317_v50, %v293_v47  ;;  %v320_v53 = vadd.f32 %v318_v51, %v294_v48 }
  0xb5   : > { %v323_v54 = vcombine.low %v319_v52, %v320_v53 }
  0xb7   : > { %325 = vst [vmem:[%s204_s7] sm:$0xff] %v323_v54 }
  0xb8   : > { %555 = shalt.err (!%p552_p3)
}
  0xb9   : > { %s556_s28 = scalar_lea.hbm %s341_s11, 128  ;;  %s560_s30 = scalar_lea.hbm %s797_s3, 256 }
  0xba   : > { %p557_p5 = scmp.ne.s32.totalorder %s341_s11, %s556_s28  ;;  %p561_p10 = scmp.lt.s32.totalorder %s341_s11, %s797_s3 }
  0xbb   : > { %p562_p4 = scmp.lt.s32.totalorder %s560_s30, %s556_s28 }
  0xbc   : > { %p558_p6 = pnand %p557_p5, %p701_p9 }
  0xbd   : > { %p563_p13 = por %p562_p4, %p561_p10 }
  0xbe   : > { %p559_p7 = pneg %p558_p6 }
  0xc0   : > { %p564_p8 = pnand %p563_p13, %p559_p7 }
  0xc2   : > { %567 = shalt.err (!%p564_p8)
}
  0xc3   : > { %446 = dma.vmem_to_hbm [thread:$0]  (%p701_p9), %s344_s8, 128, %s341_s11, %s327_s18  }
  0xc4 PF: > { %s355_s6 = sand.u32 1, %s602_s12   ;;  %p803_p11 = scmp.ne.s32.totalorder %s801_s27, 0 }
  0xc5   : > { %p804_p12 = scmp.ge.s32.totalorder %s622_s17, 2  ;;  %s356_s24 = scalar_lea.sflag [#allocation4], %s355_s6 }
  0xc7   : > { %p453_p0 = pnand %p804_p12, %p803_p11 }
  0xc9   : > { %p454_p1 = pneg %p453_p0 }
  0xcb   : > { %597 = dma.done.wait (%p454_p1), %s356_s24, 128  }
  0xcc   : > { %599 = vsyncadd (%p454_p1), %s356_s24, 4294967168  ;;  %s19_s17 = sadd.s32 1, %s622_s17   ;;  %s805_s12 = smov %s606_s13 }
  0xcd   : > { %p16_p2 = scmp.ge.s32.totalorder %s19_s17, 4   ;;  %s806_s13 = smov %s610_s14 }
  0xce   : > { %s807_s14 = smov %s706_s26  ;;  %s808_s15 = smov %s618_s16 }
  0xcf   : > { %s809_s16 = smov %s811_s20  ;;  %18 = sbr.rel (!%p16_p2) target bundleno = 6 (0x6), region = 77 }
  0xd4   :  { %361 = vsyncpa [#allocation3], 1 }
  0xd5   :  { %363 = vsyncpa [#allocation3 + $0x1], 1 }
  0xd6   :  { %364 = vsyncpa [#allocation4], 1 }
  0xd7   :  { %366 = vsyncpa [#allocation4 + $0x1], 1 }

</bundles_post_ra>
